<compile_context>
chip_gen: v7x
topology: tpu7x:2x2x1
jax: 0.10.0
libtpu: 0.0.40
codegen_flags: <defaults>
</compile_context>

<pallas_src>
import numpy as np
import jax
import jax.numpy as jnp
from jax.experimental import pallas as pl
from jax.experimental.pallas import tpu as pltpu

LANE = 128


def _round_up(v, m):
    return ((v + m - 1) // m) * m


def freq_attn2_kernel(w_ref, b_ref, x_ref, o_ref):
    # w_ref : (C, C)        f32 1x1-conv weight with attn_w folded into columns.
    # b_ref : (C, 1)        f32 conv bias.
    # x_ref : (Bblk, C, T)  native-dtype input tile (T lane-dense, multiple of 128).
    # o_ref : (Bblk, C, T)  output tile (same dtype as input).
    w = w_ref[...]
    bias = b_ref[...]
    bblk = x_ref.shape[0]
    for b in range(bblk):  # static unroll; Bblk is small
        xb = x_ref[b].astype(jnp.float32)                              # (C, T)
        y = jnp.dot(w, xb, preferred_element_type=jnp.float32) + bias  # MXU
        o_ref[b] = jax.nn.sigmoid(y).astype(o_ref.dtype)


def _choose_tiling(B, C, HW, in_itemsize, out_itemsize, vmem_budget):
    """Pick (tile_hw, HW_pad, n_hw, bblk) under a VMEM budget."""
    # Pipeline buffers: double-buffered input + double-buffered output blocks.
    per_lane_per_b = C * 2 * (in_itemsize + out_itemsize)
    resident = C * C * 4 + C * 4  # folded weight + bias (f32), resident
    budget = max(vmem_budget - resident, LANE * per_lane_per_b)

    # Spatial tile (lane dim): multiple of 128, target <= 8192 lanes, VMEM-capped.
    tile_hw = min(_round_up(HW, LANE), 8192)
    max_tile = max(LANE, ((budget // per_lane_per_b) // LANE) * LANE)
    tile_hw = max(LANE, min(tile_hw, max_tile))

    HW_pad = _round_up(HW, tile_hw)
    n_hw = HW_pad // tile_hw

    # Batch blocking for small tiles; keep >= 2 grid steps when possible (v7x).
    bblk = 1
    if tile_hw < 2048 and B > 1:
        want = min(B, max(1, 2048 // tile_hw))
        max_b = max(1, budget // (per_lane_per_b * tile_hw))
        want = min(want, max_b)
        min_grid = min(2, B * n_hw)
        for d in range(want, 0, -1):
            if B % d == 0 and (B // d) * n_hw >= min_grid:
                bblk = d
                break
    return tile_hw, HW_pad, n_hw, bblk


def frequency_attention2(x, attn_w, conv_w, conv_b, *,
                         vmem_budget_bytes=12 * 1024 * 1024):
    """x: (B, C, H, W) (f32 or bf16); attn_w: (C,); conv_w: (C, C, 1, 1); conv_b: (C,)."""
    B, C, H, W = x.shape
    HW = H * W
    in_dt = x.dtype
    out_dt = x.dtype

    tile_hw, HW_pad, n_hw, bblk = _choose_tiling(
        B, C, HW,
        jnp.dtype(in_dt).itemsize, jnp.dtype(out_dt).itemsize,
        vmem_budget_bytes)

    # Keep input in its native dtype; only reshape (free) and pad if needed.
    xf = x.reshape(B, C, HW)
    if HW_pad > HW:
        xf = jnp.pad(xf, ((0, 0), (0, 0), (0, HW_pad - HW)))

    # Fold the per-channel attention scale into the conv-weight columns (exact).
    w2d = (conv_w.reshape(C, C).astype(jnp.float32)
           * attn_w.reshape(1, C).astype(jnp.float32))
    b2d = conv_b.reshape(C, 1).astype(jnp.float32)

    out = pl.pallas_call(
        freq_attn2_kernel,
        out_shape=jax.ShapeDtypeStruct((B, C, HW_pad), out_dt),
        grid=(B // bblk, n_hw),
        in_specs=[
            pl.BlockSpec((C, C), lambda bb, s: (0, 0)),              # folded weight
            pl.BlockSpec((C, 1), lambda bb, s: (0, 0)),              # bias
            pl.BlockSpec((bblk, C, tile_hw), lambda bb, s: (bb, 0, s)),
        ],
        out_specs=pl.BlockSpec((bblk, C, tile_hw), lambda bb, s: (bb, 0, s)),
        compiler_params=pltpu.CompilerParams(
            dimension_semantics=("parallel", "parallel")),
    )(w2d, b2d, xf)

    if HW_pad > HW:
        out = out[..., :HW]
    return out.reshape(B, C, H, W)


def frequency_attention2_reference(x, attn_w, conv_w, conv_b):
    """Faithful NumPy reference mirroring the PyTorch forward exactly."""
    x = np.asarray(x, dtype=np.float64)
    attn_w = np.asarray(attn_w, dtype=np.float64)
    conv_w = np.asarray(conv_w, dtype=np.float64)
    conv_b = np.asarray(conv_b, dtype=np.float64)
    B, C, H, W = x.shape
    F = np.fft.fft2(x, axes=(-2, -1))
    mag = np.abs(F)
    refined = mag * attn_w.reshape(1, C, 1, 1)
    rec = np.fft.ifft2(refined * np.exp(1j * np.angle(F)), axes=(-2, -1)).real
    y = (np.einsum('oc,bchw->bohw', conv_w.reshape(C, C), rec)
         + conv_b.reshape(1, C, 1, 1))
    return 1.0 / (1.0 + np.exp(-y))


if __name__ == "__main__":
    key = jax.random.PRNGKey(0)
    kx, ka, kw, kb, kx2 = jax.random.split(key, 5)

    B, C, H, W = 2, 4, 16, 16
    x = jax.random.normal(kx, (B, C, H, W), dtype=jnp.float32)
    # Module initializes attention_weights to ones; perturb so the per-channel
    # scale is actually exercised. Conv params are deterministic synthetic.
    attn_w = 1.0 + 0.1 * jax.random.normal(ka, (C,), dtype=jnp.float32)
    conv_w = (1.0 / np.sqrt(C)) * jax.random.normal(kw, (C, C, 1, 1), dtype=jnp.float32)
    conv_b = 0.1 * jax.random.normal(kb, (C,), dtype=jnp.float32)

    out = frequency_attention2(x, attn_w, conv_w, conv_b)
    out = jax.block_until_ready(out)
    ref = frequency_attention2_reference(x, attn_w, conv_w, conv_b)
    assert np.allclose(np.asarray(out), ref, atol=1e-4, rtol=1e-4), (
        "Pallas output mismatch vs reference")

    # Secondary check: odd spatial size exercises the lane-padding path.
    H2 = W2 = 17
    x2 = jax.random.normal(kx2, (B, C, H2, W2), dtype=jnp.float32)
    out2 = jax.block_until_ready(frequency_attention2(x2, attn_w, conv_w, conv_b))
    ref2 = frequency_attention2_reference(x2, attn_w, conv_w, conv_b)
    assert np.allclose(np.asarray(out2), ref2, atol=1e-4, rtol=1e-4), (
        "Pallas output mismatch vs reference (padded HW)")

    print("KERNEL_OK")
</pallas_src>

<mosaic_0001>
module attributes {stable_mosaic.version = 11 : i64} {
  func.func @freq_attn2_kernel(%arg0: i32, %arg1: i32, %arg2: memref<4x4xf32, #tpu.memory_space<vmem>>, %arg3: memref<4x1xf32, #tpu.memory_space<vmem>>, %arg4: memref<1x4x256xf32, #tpu.memory_space<vmem>>, %arg5: memref<1x4x256xf32, #tpu.memory_space<vmem>>) attributes {dimension_semantics = [#tpu.dimension_semantics<parallel>, #tpu.dimension_semantics<parallel>], iteration_bounds = array<i64: 2, 1>, scalar_prefetch = 0 : i64, scratch_operands = 0 : i64, tpu.core_type = #tpu.core_type<tc>, window_params = [{pipeline_mode = #tpu.pipeline_mode<synchronous>, transform_indices = @transform_0, window_bounds = array<i64: 4, 4>}, {pipeline_mode = #tpu.pipeline_mode<synchronous>, transform_indices = @transform_1, window_bounds = array<i64: 4, 1>}, {transform_indices = @transform_2, window_bounds = array<i64: 1, 4, 256>}, {transform_indices = @transform_3, window_bounds = array<i64: 1, 4, 256>}]} {
    %c0 = arith.constant 0 : index
    %c0_0 = arith.constant 0 : index
    %0 = vector.load %arg2[%c0, %c0_0] : memref<4x4xf32, #tpu.memory_space<vmem>>, vector<4x4xf32>
    %c0_1 = arith.constant 0 : index
    %c0_2 = arith.constant 0 : index
    %1 = vector.load %arg3[%c0_1, %c0_2] : memref<4x1xf32, #tpu.memory_space<vmem>>, vector<4x1xf32>
    %c0_3 = arith.constant 0 : index
    %c0_4 = arith.constant 0 : index
    %c0_5 = arith.constant 0 : index
    %2 = vector.load %arg4[%c0_3, %c0_4, %c0_5] : memref<1x4x256xf32, #tpu.memory_space<vmem>>, vector<1x4x256xf32>
    %3 = vector.shape_cast %2 : vector<1x4x256xf32> to vector<4x256xf32>
    %cst = arith.constant dense<0.000000e+00> : vector<4x256xf32>
    %4 = tpu.matmul %0, %3, %cst {dimension_numbers = #tpu.dot_dimension_numbers<[1], [0], [0], [1], [0, 0, 1, 1], [], []>} : vector<4x4xf32>, vector<4x256xf32>, vector<4x256xf32> -> vector<4x256xf32>
    %5 = vector.broadcast %1 : vector<4x1xf32> to vector<4x256xf32>
    %6 = arith.addf %4, %5 : vector<4x256xf32>
    %7 = arith.negf %6 : vector<4x256xf32>
    %8 = math.exp %7 : vector<4x256xf32>
    %cst_6 = arith.constant 1.000000e+00 : f32
    %9 = vector.broadcast %cst_6 : f32 to vector<4x256xf32>
    %10 = arith.addf %9, %8 : vector<4x256xf32>
    %11 = arith.divf %9, %10 : vector<4x256xf32>
    %c0_7 = arith.constant 0 : index
    %c0_8 = arith.constant 0 : index
    %c0_9 = arith.constant 0 : index
    %12 = vector.load %arg5[%c0_7, %c0_8, %c0_9] : memref<1x4x256xf32, #tpu.memory_space<vmem>>, vector<1x4x256xf32>
    %13 = vector.shape_cast %12 : vector<1x4x256xf32> to vector<4x256xf32>
    %14 = vector.shape_cast %11 : vector<4x256xf32> to vector<1x4x256xf32>
    tpu.vector_store %arg5[%c0_7, %c0_8, %c0_9], %14 {strides = array<i32>} : memref<1x4x256xf32, #tpu.memory_space<vmem>>, vector<1x4x256xf32>,
    return
  }
  func.func @transform_0(%arg0: i32, %arg1: i32) -> (i32, i32) {
    %c0_i32 = arith.constant 0 : i32
    %c0_i32_0 = arith.constant 0 : i32
    %c0_i32_1 = arith.constant 0 : i32
    return %c0_i32, %c0_i32_0 : i32, i32
  }
  func.func @transform_1(%arg0: i32, %arg1: i32) -> (i32, i32) {
    %c0_i32 = arith.constant 0 : i32
    %c0_i32_0 = arith.constant 0 : i32
    %c0_i32_1 = arith.constant 0 : i32
    return %c0_i32, %c0_i32_0 : i32, i32
  }
  func.func @transform_2(%arg0: i32, %arg1: i32) -> (i32, i32, i32) {
    %c0_i32 = arith.constant 0 : i32
    %c0_i32_0 = arith.constant 0 : i32
    return %arg0, %c0_i32, %arg1 : i32, i32, i32
  }
  func.func @transform_3(%arg0: i32, %arg1: i32) -> (i32, i32, i32) {
    %c0_i32 = arith.constant 0 : i32
    %c0_i32_0 = arith.constant 0 : i32
    return %arg0, %c0_i32, %arg1 : i32, i32, i32
  }
}

</mosaic_0001>

<bundles_post_ra>
// kernel: tpu_custom_call.1
= control target key start
LH: loop header
LB: loop body
LE: loop exit
PB: predicated region body
PF: predicated region fallthrough
CT: control target
= control target key end

     0   :  { %8 = vsyncpa [#allocation3], 0  ;;  %s831_s0 = inlined_call_operand.vmem [shape: f32[4,4], index: 0, kind: input, shape index: {}]   ;;  %s832_s1 = inlined_call_operand.vmem [shape: f32[4,1], index: 1, kind: input, shape index: {}]   ;;  %s833_s2 = inlined_call_operand.hbm [shape: f32[2,4,256], index: 2, kind: input, shape index: {}]   ;;  %s834_s3 = inlined_call_operand.hbm [shape: f32[2,4,256], index: 3, kind: output, shape index: {}]  }
   0x1   :  { %10 = vsyncpa [#allocation3 + $0x1], 0 }
   0x2   :  { %11 = vsyncpa [#allocation4], 0 }
   0x3   :  { %13 = vsyncpa [#allocation4 + $0x1], 0  ;;  %s649_s12 = smov 0   ;;  %s651_s13 = smov 0  }
   0x4   :  { %s653_s14 = smov 0   ;;  %s655_s15 = smov 0  }
   0x5   :  { %s657_s16 = smov 0   ;;  %s659_s17 = smov 0  }
   0x6 LB: > { %s415_s18 = sadd.s32 4294967295, %s623_s17   ;;  %s416_s19 = sadd.s32 4294967294, %s623_s17   ;;  %s623_s17 = sphi %s659_s17, %s19_s17   ;;  %s619_s16 = sphi %s657_s16, %s850_s16   ;;  %s615_s15 = sphi %s655_s15, %s849_s15   ;;  %s611_s14 = sphi %s653_s14, %s848_s14   ;;  %s607_s13 = sphi %s651_s13, %s847_s13   ;;  %s603_s12 = sphi %s649_s12, %s846_s12  }
   0x7   : > { %s31_s20 = sadd.s32 1, %s619_s16  ;;  %s82_s21 = sadd.s32 1, %s611_s14 }
   0x8   : > { %p33_p0 = scmp.ge.s32.totalorder %s31_s20, 2  ;;  %p89_p1 = scmp.ne.s32.totalorder %s611_s14, %s607_s13 }
   0x9   : > { %p90_p2 = scmp.eq.s32.totalorder %s623_s17, 0  ;;  %p95_p3 = scmp.ne.s32.totalorder %s607_s13, %s603_s12 }
   0xa   : > { %s852_s20 = smov (%p33_p0, %s31_s20), 0  ;;  %p96_p5 = scmp.eq.s32.totalorder %s415_s18, 0 }
   0xb   : > { %p690_p4 = por %p90_p2, %p89_p1  ;;  %s77_s23 = ssub.s32 %s619_s16, %s852_s20 }
   0xc   : > { %p121_p6 = scmp.eq.s32.totalorder %s415_s18, 1  ;;  %p80_p7 = scmp.eq.s32.totalorder %s77_s23, 0 }
   0xd   : > { %p696_p8 = por %p96_p5, %p95_p3  ;;  %p127_p10 = scmp.eq.s32.totalorder %s416_s19, 1 }
   0xe   : > { %p700_p9 = por %p121_p6, %p89_p1  ;;  %p449_p13 = scmp.lt.s32.totalorder %s623_s17, 2 }
   0xf   : > { %s705_s26 = scalar_select %p80_p7, %s611_s14, %s82_s21  }
  0x10   : > { %s838_s25 = scalar_select %p700_p9, 1, 0 }
  0x11   : > { %p707_p11 = por %p127_p10, %p95_p3  ;;  %s153_s28 = sand.u32 1, %s611_s14  }
  0x12   : > { %s419_s29 = sshll.u32 %s153_s28, 3  ;;  %s435_s30 = sshll.u32 %s619_s16, 7 }
  0x13   : > { %s839_s27 = scalar_select %p707_p11, 1, 0 }
  0x14   : > { %s718_s6 = scalar_lea.hbm %s833_s2, %s435_s30  ;;  %s157_s7 = scalar_lea.vmem [#allocation2], %s419_s29 }
  0x15   : > { %s167_s8 = sshll.u32 %s157_s7, 4  ;;  %p724_p0 = pnand %p449_p13, %p690_p4  ;;  %s720_s8 = int_to_ptr.vmem [resolvable:$true] %s167_s8 }
  0x16   : > { %s154_s10 = scalar_lea.sflag [#allocation3], %s153_s28  ;;  %s511_s11 = scalar_lea.hbm %s718_s6, 128 }
  0x17   : > { %p512_p3 = scmp.ne.s32.totalorder %s718_s6, %s511_s11  ;;  %p513_p5 = pneg %p724_p0 }
  0x18   : > { %s516_s21 = scalar_lea.hbm %s833_s2, 256  ;;  %p517_p4 = scmp.lt.u32.totalorder %s718_s6, %s833_s2 }
  0x19   : > { %p514_p6 = pnand %p513_p5, %p512_p3  ;;  %p518_p10 = scmp.lt.u32.totalorder %s516_s21, %s511_s11 }
  0x1a   : > { %p520_p12 = scmp.lt.u32.totalorder %s511_s11, %s718_s6 }
  0x1b   : > { %p515_p7 = pneg %p514_p6  ;;  %p519_p13 = por %p518_p10, %p517_p4 }
  0x1d   : > { %p521_p1 = por %p520_p12, %p519_p13 }
  0x1f   : > { %p522_p2 = pnand %p521_p1, %p515_p7 }
  0x21   : > { %525 = shalt.err (!%p522_p2)
}
  0x22   : > { %s526_s28 = scalar_lea.vmem %s720_s8, 128  ;;  %s625_s29 = smov [#allocation2]  }
  0x23   : > { %p527_p3 = scmp.ne.s32.totalorder %s720_s8, %s526_s28  ;;  %s531_s30 = sshll.u32 %s625_s29, 4  ;;  %s532_s30 = int_to_ptr.vmem [resolvable:$false] %s531_s30 }
  0x24   : > { %s533_s4 = scalar_lea.vmem %s532_s30, 256  ;;  %p534_p9 = scmp.lt.s32.totalorder %s720_s8, %s532_s30 }
  0x25   : > { %p529_p6 = pnand %p527_p3, %p513_p5  ;;  %p535_p4 = scmp.lt.s32.totalorder %s533_s4, %s526_s28 }
  0x27   : > { %p530_p11 = pneg %p529_p6  ;;  %p536_p10 = por %p535_p4, %p534_p9 }
  0x29   : > { %p537_p12 = pnand %p536_p10, %p530_p11 }
  0x2b   : > { %540 = shalt.err (!%p537_p12)
}
  0x2c   : > { %444 = dma.hbm_to_vmem [thread:$0]  (!%p724_p0), %s718_s6, 128, %s720_s8, %s154_s10  }
  0x2d   : > { %p841_p1 = scmp.lt.s32.totalorder %s623_s17, 3  ;;  %p842_p2 = scmp.ge.s32.totalorder %s623_s17, 1 }
  0x2f   : > { %p173_p5 = pnand %p842_p2, %p841_p1 }
  0x30   : > { %s760_s5 = sand.u32 (!%p173_p5), 1, %s607_s13  }
  0x31   : > { %176 = sbr.rel (%p173_p5) target bundleno = 319 (0x13f), region = 32  ;;  %s423_s7 = sshll.u32 (!%p173_p5), %s760_s5, 3 }
  0x32   : > { %s179_s11 = scalar_lea.sflag (!%p173_p5), [#allocation3], %s760_s5  ;;  %s182_s9 = scalar_lea.vmem (!%p173_p5), [#allocation2], %s423_s7 }
  0x38   : > { %594 = dma.done.wait (%p696_p8), %s179_s11, 128  }
  0x39   : > { %596 = vsyncadd (%p696_p8), %s179_s11, 4294967168  ;;  %v626_v0 = vmov 0.0   ;;  %v627_v1 = vmov 0   ;;  %v209_v2 = vld [vmem:[%s182_s9] sm:$0xff]  ;;  %vm221_vm0 = vcmask 1043456   ;;  %vm217_vm1 = vcmask 31744  }
  0x3a   : > { %290 = vmatprep.mubr.f32.mxu0 %v626_v0  ;;  %501 = vset.pattern.permute.xlu0 %v627_v1  ;;  %v208_v3 = vld [vmem:[%s832_s1] sm:$0xf]  ;;  %v216_v4 = vcombine.high %v209_v2, %v209_v2  ;;  %s436_s24 = sshll.u32 %s615_s15, 7  ;;  %s204_s19 = scalar_lea.vmem [#allocation5], %s423_s7 }
  0x3b   : > { %212 = vperm.xlu0 %501, %v208_v3   ;;  %v207_v5 = vld [vmem:[%s831_s0] sm:$0xf]  ;;  %s331_s21 = sshll.u32 %s204_s19, 4  ;;  %s782_s28 = scalar_lea.hbm %s834_s3, %s436_s24  ;;  %s784_s21 = int_to_ptr.vmem [resolvable:$true] %s331_s21 }
  0x3c   : > { %425 = vmatprep.subr.msk.mxu0 %vm221_vm0, %v216_v4  ;;  %s315_s29 = scalar_lea.sflag [#allocation4], %s760_s5  ;;  %s541_s30 = scalar_lea.vmem %s784_s21, 128 }
  0x3d   : > { %426 = vmatpush1.msk.msra.mxu0 %vm221_vm0, %v209_v2  ;;  %p542_p8 = scmp.ne.s32.totalorder %s784_s21, %s541_s30  ;;  %p843_p9 = scmp.ne.s32.totalorder %s838_s25, 0 }
  0x3e   : > { %427 = vmatmul.mubr.msk.f32.vlgmr.msra.gmra.mrb[0].mxu0 %vm217_vm1, %v207_v5  ;;  %s628_s15 = smov [#allocation5]  }
  0x3f   : > { %p543_p11 = pnand %p542_p8, %p843_p9  ;;  %s545_s4 = sshll.u32 %s628_s15, 4  ;;  %s546_s4 = int_to_ptr.vmem [resolvable:$false] %s545_s4 }
  0x40   : > { %s547_s7 = scalar_lea.vmem %s546_s4, 256  ;;  %p548_p7 = scmp.lt.s32.totalorder %s784_s21, %s546_s4 }
  0x41   : > { %p544_p0 = pneg %p543_p11  ;;  %p549_p13 = scmp.lt.s32.totalorder %s547_s7, %s541_s30 }
  0x43   : > { %p550_p3 = por %p549_p13, %p548_p7 }
  0x45   : > { %p551_p6 = pnand %p550_p3, %p544_p0 }
  0xba   : > { %v213_v6 = vpop.permute.xlu0 %212 }
 0x111   : > { %v292_v7 = vpop.f32.mrb[0].mxu0 }
 0x112   : > { %v293_v8 = vadd.f32 %v292_v7, %v213_v6  ;;  %v294_v9 = vpop.f32.mrb[1].mxu0 }
 0x113   : > { %v295_v10 = vadd.f32 %v294_v9, %v213_v6 }
 0x114   : > { %v428_v11 = vmul.f32 -1.442695, %v293_v8 }
 0x115   : > { %v429_v12 = vmul.f32 -1.442695, %v295_v10 }
 0x116   : > { %503 = vpow2.f32 %v428_v11 }
 0x117   : > { %505 = vpow2.f32 %v429_v12 }
 0x120   : > { %v504_v13 = vpop.eup %503 }
 0x121   : > { %v506_v14 = vpop.eup %505  ;;  %v303_v15 = vadd.f32 1.0, %v504_v13 }
 0x122   : > { %v304_v16 = vadd.f32 1.0, %v506_v14 }
 0x123   : > { %507 = vrcp.f32 %v303_v15 }
 0x124   : > { %509 = vrcp.f32 %v304_v16 }
 0x12d   : > { %v508_v17 = vpop.eup %507 }
 0x12e   : > { %v510_v18 = vpop.eup %509 }
 0x12f   : > { %v311_v19 = vcombine.low %v508_v17, %v510_v18 }
 0x131   : > { %313 = vst [vmem:[%s204_s19] sm:$0xff] %v311_v19 }
 0x132   : > { %554 = shalt.err (!%p551_p6)
}
 0x133   : > { %s555_s5 = scalar_lea.hbm %s782_s28, 128  ;;  %s559_s6 = scalar_lea.hbm %s834_s3, 256 }
 0x134   : > { %p556_p4 = scmp.ne.s32.totalorder %s782_s28, %s555_s5  ;;  %p560_p1 = scmp.lt.u32.totalorder %s782_s28, %s834_s3 }
 0x135   : > { %p561_p2 = scmp.lt.u32.totalorder %s559_s6, %s555_s5  ;;  %p563_p8 = scmp.lt.u32.totalorder %s555_s5, %s782_s28 }
 0x136   : > { %p557_p10 = pnand %p556_p4, %p843_p9 }
 0x137   : > { %p562_p5 = por %p561_p2, %p560_p1 }
 0x138   : > { %p558_p12 = pneg %p557_p10 }
 0x139   : > { %p564_p11 = por %p563_p8, %p562_p5 }
 0x13b   : > { %p565_p0 = pnand %p564_p11, %p558_p12 }
 0x13d   : > { %568 = shalt.err (!%p565_p0)
}
 0x13e   : > { %439 = dma.vmem_to_hbm [thread:$0]  (%p843_p9), %s784_s21, 128, %s782_s28, %s315_s29  }
 0x13f PF: > { %s343_s18 = sand.u32 1, %s603_s12   ;;  %p844_p7 = scmp.ne.s32.totalorder %s839_s27, 0 }
 0x140   : > { %p845_p13 = scmp.ge.s32.totalorder %s623_s17, 2  ;;  %s344_s24 = scalar_lea.sflag [#allocation4], %s343_s18 }
 0x142   : > { %p446_p3 = pnand %p845_p13, %p844_p7 }
 0x144   : > { %598 = dma.done.wait (!%p446_p3), %s344_s24, 128  }
 0x145   : > { %600 = vsyncadd (!%p446_p3), %s344_s24, 4294967168  ;;  %s19_s17 = sadd.s32 1, %s623_s17   ;;  %s846_s12 = smov %s607_s13 }
 0x146   : > { %p16_p6 = scmp.ge.s32.totalorder %s19_s17, 4   ;;  %s847_s13 = smov %s611_s14 }
 0x147   : > { %s848_s14 = smov %s705_s26  ;;  %s849_s15 = smov %s619_s16 }
 0x148   : > { %s850_s16 = smov %s852_s20  ;;  %18 = sbr.rel (!%p16_p6) target bundleno = 6 (0x6), region = 77 }
 0x14f   :  { %349 = vsyncpa [#allocation3], 1 }
 0x150   :  { %351 = vsyncpa [#allocation3 + $0x1], 1 }
 0x151   :  { %352 = vsyncpa [#allocation4], 1 }
 0x152   :  { %354 = vsyncpa [#allocation4 + $0x1], 1 }

</bundles_post_ra>
